<compile_context>
chip_gen: v6e
topology: v6e:2x2x1
jax: 0.10.0
libtpu: 0.0.40
codegen_flags: <defaults>
</compile_context>

<pallas_src>
import math
import functools

import jax
import jax.numpy as jnp
from jax import lax
from jax.experimental import pallas as pl
from jax.experimental.pallas import tpu as pltpu


# ----------------------------- small utilities --------------------------------

@functools.lru_cache(maxsize=None)
def _pipeline_mode_supported():
    """Probe once whether BlockSpec(pipeline_mode=pl.Buffered(k)) lowers on this
    jax/libtpu build (used to single-buffer grid-invariant weights and deepen
    buffering of the streamed lm_head weight)."""
    if not hasattr(pl, "Buffered"):
        return False
    try:
        def _k(a_ref, b_ref, o_ref):
            o_ref[...] = a_ref[...] + b_ref[...]
        a = jnp.zeros((8, 128), jnp.float32)
        b = jnp.zeros((32, 128), jnp.float32)
        out = pl.pallas_call(
            _k,
            out_shape=jax.ShapeDtypeStruct((32, 128), jnp.float32),
            grid=(4,),
            in_specs=[pl.BlockSpec((8, 128), lambda i: (0, 0),
                                   pipeline_mode=pl.Buffered(1)),
                      pl.BlockSpec((8, 128), lambda i: (i, 0),
                                   pipeline_mode=pl.Buffered(3))],
            out_specs=pl.BlockSpec((8, 128), lambda i: (i, 0)),
        )(a, b)
        jax.block_until_ready(out)
        return True
    except Exception:
        return False


def _vmem_cap_bytes():
    """Per-core VMEM budget (with headroom).  Falls back to the v7x 64 MiB
    figure so the budget is valid on every TPU generation."""
    try:
        cap = int(pltpu.get_tpu_info().vmem_capacity_bytes)
    except Exception:
        cap = 64 << 20
    return (cap * 7) // 8


def _inv_spec(arr, pipeline_mode=None):
    """Full-array BlockSpec with a grid-invariant index map (weights/biases)."""
    n = arr.ndim
    idx = lambda *_, _n=n: (0,) * _n
    if pipeline_mode is None:
        return pl.BlockSpec(arr.shape, idx)
    return pl.BlockSpec(arr.shape, idx, pipeline_mode=pipeline_mode)


def _nbytes(a):
    return a.size * a.dtype.itemsize


def _pick_seq_tile(T, target=256):
    # >=256 keeps the MXU M/N dims filled on v6e/v7x; v5e's 128x128 MXU would be
    # equally happy with 128.  TODO(synk): select per-chip.
    if T <= target:
        return T
    for t in range(target, 0, -128):
        if T % t == 0:
            return t
    return T


def _pick_mlp_chunk(n_hidden, target=512):
    if n_hidden <= target:
        return n_hidden
    for c in range(target, 127, -128):
        if n_hidden % c == 0:
            return c
    return n_hidden


# ----------------------------- in-kernel helpers -------------------------------

def _layernorm(v, w, b, eps=1e-5):
    # f32 math (v5e has no bf16 VPU datapath).
    mu = jnp.mean(v, axis=-1, keepdims=True)
    var = jnp.mean((v - mu) ** 2, axis=-1, keepdims=True)
    return (v - mu) * lax.rsqrt(var + eps) * w + b


def _gelu_tanh(x):
    # Matches the reference torch.jit.script gelu() (tanh approximation).
    return 0.5 * x * (1.0 + jnp.tanh(math.sqrt(2.0 / math.pi)
                                     * (x + 0.044715 * x * x * x)))


# ------------------------------ transformer block ------------------------------

def block_kernel(x_ref, ln1w, ln1b, wq, wk, wv, bq, bk, bv, wo, bo,
                 ln2w, ln2b, wfc, bfc, wpr, bpr, out_ref,
                 *, T, C, H, TSEQ, MLP_CHUNK):
    D = C // H
    scale = 1.0 / math.sqrt(D)
    x = x_ref[0].astype(jnp.float32)                       # (T, C) residual, f32

    # --- LN1 + q/k/v projections: three (C,C) dots, so no (T,3C) f32 is live ---
    h1b = _layernorm(x, ln1w[...], ln1b[...]).astype(jnp.bfloat16)

    def proj_heads(w_ref, b_ref):
        p = jnp.dot(h1b, w_ref[...], preferred_element_type=jnp.float32) + b_ref[...]
        # Single stack over heads -> (H, T, D).  Value-level slices only; no
        # per-head masked sub-128-lane stores into scratch.
        return jnp.stack([p[:, hh * D:(hh + 1) * D] for hh in range(H)],
                         axis=0).astype(jnp.bfloat16)

    q = proj_heads(wq, bq)                                 # (H, T, D) bf16
    k = proj_heads(wk, bk)
    v = proj_heads(wv, bv)

    # --- flash-style attention: tile over q / kv with online softmax; kv tiles
    #     strictly above the diagonal are skipped entirely (causal tile skip) ---
    y_rows = []
    n_tiles = T // TSEQ
    for qi in range(n_tiles):
        q_t = q[:, qi * TSEQ:(qi + 1) * TSEQ, :]           # (H, TQ, D)
        m_i = jnp.full((H, TSEQ, 1), -1e30, jnp.float32)
        l_i = jnp.zeros((H, TSEQ, 1), jnp.float32)
        acc = jnp.zeros((H, TSEQ, D), jnp.float32)
        for ki in range(qi + 1):                           # causal tile skip
            k_t = k[:, ki * TSEQ:(ki + 1) * TSEQ, :]
            v_t = v[:, ki * TSEQ:(ki + 1) * TSEQ, :]
            s = jnp.einsum('hqd,hkd->hqk', q_t, k_t,
                           preferred_element_type=jnp.float32) * scale
            if ki == qi:
                # Causal mask generated in-kernel on the diagonal tile only.
                row = lax.broadcasted_iota(jnp.int32, (TSEQ, TSEQ), 0)
                col = lax.broadcasted_iota(jnp.int32, (TSEQ, TSEQ), 1)
                s = jnp.where((row >= col)[None, :, :], s, -1e30)
            m_new = jnp.maximum(m_i, jnp.max(s, axis=-1, keepdims=True))
            alpha = jnp.exp(m_i - m_new)
            p = jnp.exp(s - m_new)
            l_i = alpha * l_i + jnp.sum(p, axis=-1, keepdims=True)
            acc = alpha * acc + jnp.einsum('hqk,hkd->hqd', p.astype(jnp.bfloat16),
                                           v_t, preferred_element_type=jnp.float32)
            m_i = m_new
        ctx = acc * pl.reciprocal(l_i, approx=True)        # (H, TQ, D) f32, EUP recip

        # Head merge fused into the output projection:
        #   y_tile = sum_h ctx[h] @ Wo[h*D:(h+1)*D, :]
        # (no lane-axis concatenate, no masked scatter, no y scratch)
        y_t = jnp.zeros((TSEQ, C), jnp.float32)
        for hh in range(H):
            y_t = y_t + jnp.dot(ctx[hh].astype(jnp.bfloat16),
                                wo[hh * D:(hh + 1) * D, :],
                                preferred_element_type=jnp.float32)
        y_rows.append(y_t)

    y = y_rows[0] if n_tiles == 1 else jnp.concatenate(y_rows, axis=0)
    x = x + y + bo[...]                                    # attn residual

    # --- LN2 + MLP, chunked over the 4C hidden axis (no (T,4C) f32 is live) ---
    h2b = _layernorm(x, ln2w[...], ln2b[...]).astype(jnp.bfloat16)
    ff = jnp.zeros((T, C), jnp.float32)
    for n0 in range(0, 4 * C, MLP_CHUNK):
        n1 = n0 + MLP_CHUNK
        g = jnp.dot(h2b, wfc[:, n0:n1],
                    preferred_element_type=jnp.float32) + bfc[:, n0:n1]
        g = _gelu_tanh(g)
        ff = ff + jnp.dot(g.astype(jnp.bfloat16), wpr[n0:n1, :],
                          preferred_element_type=jnp.float32)
    ff = ff + bpr[...]

    # dropout p = 0.0 -> identity
    out_ref[0] = (x + ff).astype(out_ref.dtype)            # bf16 residual stream


def run_block(x, params, *, T, C, H):
    B = x.shape[0]
    D = C // H
    TSEQ = _pick_seq_tile(T)
    MLP_CHUNK = _pick_mlp_chunk(4 * C)
    assert T % TSEQ == 0 and (4 * C) % MLP_CHUNK == 0

    buffered = _pipeline_mode_supported()
    inv_mode = pl.Buffered(1) if buffered else None        # single-buffer invariants

    in_specs = [pl.BlockSpec((1, T, C), lambda b: (b, 0, 0))]
    in_specs += [_inv_spec(p, inv_mode) for p in params]

    # --- explicit VMEM budget (raise instead of silently clamping) ---
    act_bytes = 2 * 2 * (T * C * 2)                        # x & out blocks, dbl-buffered bf16
    weight_bytes = (1 if buffered else 2) * sum(_nbytes(p) for p in params)
    interm_bytes = (4 * T * C * 4                          # f32 residual / LN / ff / y
                    + 3 * T * C * 2                        # q/k/v bf16
                    + H * TSEQ * TSEQ * 4                  # per-tile scores
                    + 3 * H * TSEQ * D * 4                 # per-tile m/l/acc/ctx
                    + 2 * T * MLP_CHUNK * 4)               # per-chunk MLP intermediate
    needed = act_bytes + weight_bytes + interm_bytes + (2 << 20)
    cap = _vmem_cap_bytes()
    if needed > cap:
        raise ValueError(
            f"transformer-block kernel needs ~{needed >> 20} MiB VMEM but only "
            f"{cap >> 20} MiB is budgeted; reduce TSEQ/MLP_CHUNK or tile the weights.")
    vmem_limit = int(min(cap, max(needed, 32 << 20)))

    kernel = functools.partial(block_kernel, T=T, C=C, H=H,
                               TSEQ=TSEQ, MLP_CHUNK=MLP_CHUNK)
    # TODO(synk): add a parallel q-tile grid axis so v7x's two TensorCores have
    #             work when B <= 2, and fold B into the matmul M dim at tiny T.
    return pl.pallas_call(
        kernel,
        out_shape=jax.ShapeDtypeStruct((B, T, C), x.dtype),
        grid=(B,),
        in_specs=in_specs,
        out_specs=pl.BlockSpec((1, T, C), lambda b: (b, 0, 0)),
        compiler_params=pltpu.CompilerParams(
            dimension_semantics=("parallel",),              # batch is independent
            vmem_limit_bytes=vmem_limit),
    )(x, *params)


# --------------------------- final LN + tied lm_head ----------------------------

def final_ln_kernel(x_ref, lnw, lnb, out_ref):
    out_ref[...] = _layernorm(x_ref[...].astype(jnp.float32),
                              lnw[...], lnb[...]).astype(out_ref.dtype)


def lm_head_kernel(h_ref, wte_ref, out_ref):
    # logits tile = h @ wte_tile^T: contract C on both sides so wte.T is never
    # materialized; lane-dense (multiple-of-128) output stores.
    out_ref[...] = lax.dot_general(
        h_ref[...], wte_ref[...],
        dimension_numbers=(((1,), (1,)), ((), ())),
        preferred_element_type=jnp.float32)


def run_head(x_last, lnw, lnb, wte):
    B, C = x_last.shape
    V = wte.shape[0]

    # Final LayerNorm hoisted out of the vocab loop (computed exactly once).
    h = pl.pallas_call(
        final_ln_kernel,
        out_shape=jax.ShapeDtypeStruct((B, C), jnp.bfloat16),
    )(x_last, lnw, lnb)

    # Pad the vocab to a multiple of 128 so every output tile is lane-dense.
    V_pad = ((V + 127) // 128) * 128
    if V_pad != V:
        wte = jnp.pad(wte, ((0, V_pad - V), (0, 0)))

    buffered = _pipeline_mode_supported()
    cap = _vmem_cap_bytes()

    # Largest lane-dense vocab tile that fits the VMEM budget (this kernel is
    # HBM-bound; big tiles amortize per-step overhead).
    tile_v = 128
    for t in (8192, 4096, 2048, 1024, 512, 256, 128):
        if V_pad % t == 0:
            need = 3 * t * C * 2 + 2 * B * t * 4 + B * C * 2 + (2 << 20)
            if need <= cap:
                tile_v = t
                break
    n_tiles = V_pad // tile_v

    h_mode = pl.Buffered(1) if buffered else None
    wte_mode = pl.Buffered(3) if (buffered and n_tiles >= 3) else None
    h_spec = _inv_spec(h, h_mode)
    if wte_mode is None:
        wte_spec = pl.BlockSpec((tile_v, C), lambda j: (j, 0))
    else:
        wte_spec = pl.BlockSpec((tile_v, C), lambda j: (j, 0), pipeline_mode=wte_mode)

    needed = 3 * tile_v * C * 2 + 2 * B * tile_v * 4 + B * C * 2 + (2 << 20)
    vmem_limit = int(min(cap, max(needed, 32 << 20)))

    logits = pl.pallas_call(
        lm_head_kernel,
        out_shape=jax.ShapeDtypeStruct((B, V_pad), jnp.float32),
        grid=(n_tiles,),
        in_specs=[h_spec, wte_spec],
        out_specs=pl.BlockSpec((B, tile_v), lambda j: (0, j)),
        compiler_params=pltpu.CompilerParams(
            dimension_semantics=("parallel",),
            vmem_limit_bytes=vmem_limit),
    )(h, wte)
    return logits[:, :V]


# ----------------------------------- GPT model ----------------------------------

def init_params(key, *, vocab, block_size, n_layer, n_head, n_embd):
    C = n_embd
    std = 0.02
    std_proj = 0.02 / math.sqrt(2 * n_layer)
    keys = jax.random.split(key, 2 + 4 * n_layer)
    wdt = jnp.bfloat16   # matmul weights in bf16 (f32 accumulation in-kernel)

    params = {
        "wte": (jax.random.normal(keys[0], (vocab, C), jnp.float32) * std).astype(wdt),
        "wpe": (jax.random.normal(keys[1], (block_size, C), jnp.float32) * std).astype(wdt),
        "ln_f_w": jnp.ones((1, C), jnp.float32),
        "ln_f_b": jnp.zeros((1, C), jnp.float32),
        "blocks": [],
    }
    for l in range(n_layer):
        k0, k1, k2, k3 = keys[2 + 4 * l: 2 + 4 * (l + 1)]
        wqkv = (jax.random.normal(k0, (C, 3 * C), jnp.float32) * std).astype(wdt)
        blk = (
            jnp.ones((1, C), jnp.float32),                                        # ln1 w
            jnp.zeros((1, C), jnp.float32),                                       # ln1 b
            wqkv[:, 0 * C:1 * C],                                                 # wq
            wqkv[:, 1 * C:2 * C],                                                 # wk
            wqkv[:, 2 * C:3 * C],                                                 # wv
            jnp.zeros((1, C), jnp.float32),                                       # bq
            jnp.zeros((1, C), jnp.float32),                                       # bk
            jnp.zeros((1, C), jnp.float32),                                       # bv
            (jax.random.normal(k1, (C, C), jnp.float32) * std_proj).astype(wdt),  # attn c_proj W
            jnp.zeros((1, C), jnp.float32),                                       # attn c_proj b
            jnp.ones((1, C), jnp.float32),                                        # ln2 w
            jnp.zeros((1, C), jnp.float32),                                       # ln2 b
            (jax.random.normal(k2, (C, 4 * C), jnp.float32) * std).astype(wdt),   # c_fc W
            jnp.zeros((1, 4 * C), jnp.float32),                                   # c_fc b
            (jax.random.normal(k3, (4 * C, C), jnp.float32) * std_proj).astype(wdt),  # mlp c_proj W
            jnp.zeros((1, C), jnp.float32),                                       # mlp c_proj b
        )
        params["blocks"].append(blk)
    return params


def gpt_forward(params, idx, *, n_head):
    # idx: (B, T) int32 token ids; dropout = 0.0 -> identity everywhere.
    B, T = idx.shape
    C = params["wte"].shape[1]

    # TODO(synk): the embedding gather stays in plain JAX; a Pallas version
    #             would need a scalar-prefetch DMA gather over the token ids.
    tok_emb = jnp.take(params["wte"], idx, axis=0).astype(jnp.float32)   # (B,T,C)
    pos_emb = params["wpe"][:T][None, :, :].astype(jnp.float32)          # (1,T,C)
    x = (tok_emb + pos_emb).astype(jnp.bfloat16)   # bf16 residual stream in HBM

    for blk in params["blocks"]:
        x = run_block(x, blk, T=T, C=C, H=n_head)

    # logits for the last position only (targets=None branch), tied lm_head.
    x_last = x[:, -1, :]                                                  # (B, C)
    logits = run_head(x_last, params["ln_f_w"], params["ln_f_b"], params["wte"])
    return logits[:, None, :]                                             # (B, 1, V)


# ------------------------------ pure-JAX reference ------------------------------

def gpt_reference(params, idx, *, n_head):
    B, T = idx.shape
    C = params["wte"].shape[1]
    H = n_head
    D = C // H
    f32 = jnp.float32
    wte = params["wte"].astype(f32)
    x = jnp.take(wte, idx, axis=0) + params["wpe"][:T].astype(f32)[None]

    def ln(v, w, b):
        mu = jnp.mean(v, axis=-1, keepdims=True)
        var = jnp.mean((v - mu) ** 2, axis=-1, keepdims=True)
        return (v - mu) / jnp.sqrt(var + 1e-5) * w + b

    causal = jnp.tril(jnp.ones((T, T), bool))
    for blk in params["blocks"]:
        (ln1w, ln1b, wq, wk, wv, bq, bk, bv, wo, bo,
         ln2w, ln2b, wfc, bfc, wpr, bpr) = [p.astype(f32) for p in blk]
        h = ln(x, ln1w, ln1b)
        q = (h @ wq + bq).reshape(B, T, H, D).transpose(0, 2, 1, 3)
        k = (h @ wk + bk).reshape(B, T, H, D).transpose(0, 2, 1, 3)
        v = (h @ wv + bv).reshape(B, T, H, D).transpose(0, 2, 1, 3)
        s = jnp.einsum('bhqd,bhkd->bhqk', q, k) / math.sqrt(D)
        s = jnp.where(causal[None, None], s, -jnp.inf)
        p = jax.nn.softmax(s, axis=-1)
        y = jnp.einsum('bhqk,bhkd->bhqd', p, v).transpose(0, 2, 1, 3).reshape(B, T, C)
        x = x + y @ wo + bo
        h2 = ln(x, ln2w, ln2b)
        g = h2 @ wfc + bfc
        g = 0.5 * g * (1.0 + jnp.tanh(math.sqrt(2.0 / math.pi) * (g + 0.044715 * g ** 3)))
        x = x + g @ wpr + bpr
    h = ln(x[:, -1, :], params["ln_f_w"].astype(f32), params["ln_f_b"].astype(f32))
    return (h @ wte.T)[:, None, :]


# --------------------------------------- main -----------------------------------

if __name__ == "__main__":
    # Small GPTConfig-consistent shapes
    vocab_size = 128
    block_size = 16
    n_layer = 2
    n_head = 2
    n_embd = 32
    B, T = 2, 8

    key = jax.random.PRNGKey(0)
    pkey, ikey = jax.random.split(key)
    params = init_params(pkey, vocab=vocab_size, block_size=block_size,
                         n_layer=n_layer, n_head=n_head, n_embd=n_embd)
    idx = jax.random.randint(ikey, (B, T), 0, vocab_size, dtype=jnp.int32)

    logits = gpt_forward(params, idx, n_head=n_head)
    logits = jax.block_until_ready(logits)

    assert logits.shape == (B, 1, vocab_size), logits.shape
    assert bool(jnp.all(jnp.isfinite(logits)))

    # Loose correctness check against a pure-JAX f32 reference (kernel uses bf16
    # matmul inputs, a bf16 residual stream and an approx softmax reciprocal).
    ref = gpt_reference(params, idx, n_head=n_head)
    err = float(jnp.max(jnp.abs(logits - ref)))
    scale = float(jnp.max(jnp.abs(ref))) + 1e-6
    assert err / scale < 0.05, (err, scale)

    print("KERNEL_OK")
</pallas_src>

<mosaic_0001>
module attributes {stable_mosaic.version = 11 : i64} {
  func.func @block_kernel(%arg0: i32, %arg1: memref<1x8x32xbf16, #tpu.memory_space<vmem>>, %arg2: memref<1x32xf32, #tpu.memory_space<vmem>>, %arg3: memref<1x32xf32, #tpu.memory_space<vmem>>, %arg4: memref<32x32xbf16, #tpu.memory_space<vmem>>, %arg5: memref<32x32xbf16, #tpu.memory_space<vmem>>, %arg6: memref<32x32xbf16, #tpu.memory_space<vmem>>, %arg7: memref<1x32xf32, #tpu.memory_space<vmem>>, %arg8: memref<1x32xf32, #tpu.memory_space<vmem>>, %arg9: memref<1x32xf32, #tpu.memory_space<vmem>>, %arg10: memref<32x32xbf16, #tpu.memory_space<vmem>>, %arg11: memref<1x32xf32, #tpu.memory_space<vmem>>, %arg12: memref<1x32xf32, #tpu.memory_space<vmem>>, %arg13: memref<1x32xf32, #tpu.memory_space<vmem>>, %arg14: memref<32x128xbf16, #tpu.memory_space<vmem>>, %arg15: memref<1x128xf32, #tpu.memory_space<vmem>>, %arg16: memref<128x32xbf16, #tpu.memory_space<vmem>>, %arg17: memref<1x32xf32, #tpu.memory_space<vmem>>, %arg18: memref<1x8x32xbf16, #tpu.memory_space<vmem>>) attributes {dimension_semantics = [#tpu.dimension_semantics<parallel>], iteration_bounds = array<i64: 2>, scalar_prefetch = 0 : i64, scratch_operands = 0 : i64, tpu.core_type = #tpu.core_type<tc>, window_params = [{transform_indices = @transform_0, window_bounds = array<i64: 1, 8, 32>}, {pipeline_mode = #tpu.pipeline_mode<synchronous>, transform_indices = @transform_1, window_bounds = array<i64: 1, 32>}, {pipeline_mode = #tpu.pipeline_mode<synchronous>, transform_indices = @transform_2, window_bounds = array<i64: 1, 32>}, {pipeline_mode = #tpu.pipeline_mode<synchronous>, transform_indices = @transform_3, window_bounds = array<i64: 32, 32>}, {pipeline_mode = #tpu.pipeline_mode<synchronous>, transform_indices = @transform_4, window_bounds = array<i64: 32, 32>}, {pipeline_mode = #tpu.pipeline_mode<synchronous>, transform_indices = @transform_5, window_bounds = array<i64: 32, 32>}, {pipeline_mode = #tpu.pipeline_mode<synchronous>, transform_indices = @transform_6, window_bounds = array<i64: 1, 32>}, {pipeline_mode = #tpu.pipeline_mode<synchronous>, transform_indices = @transform_7, window_bounds = array<i64: 1, 32>}, {pipeline_mode = #tpu.pipeline_mode<synchronous>, transform_indices = @transform_8, window_bounds = array<i64: 1, 32>}, {pipeline_mode = #tpu.pipeline_mode<synchronous>, transform_indices = @transform_9, window_bounds = array<i64: 32, 32>}, {pipeline_mode = #tpu.pipeline_mode<synchronous>, transform_indices = @transform_10, window_bounds = array<i64: 1, 32>}, {pipeline_mode = #tpu.pipeline_mode<synchronous>, transform_indices = @transform_11, window_bounds = array<i64: 1, 32>}, {pipeline_mode = #tpu.pipeline_mode<synchronous>, transform_indices = @transform_12, window_bounds = array<i64: 1, 32>}, {pipeline_mode = #tpu.pipeline_mode<synchronous>, transform_indices = @transform_13, window_bounds = array<i64: 32, 128>}, {pipeline_mode = #tpu.pipeline_mode<synchronous>, transform_indices = @transform_14, window_bounds = array<i64: 1, 128>}, {pipeline_mode = #tpu.pipeline_mode<synchronous>, transform_indices = @transform_15, window_bounds = array<i64: 128, 32>}, {pipeline_mode = #tpu.pipeline_mode<synchronous>, transform_indices = @transform_16, window_bounds = array<i64: 1, 32>}, {transform_indices = @transform_17, window_bounds = array<i64: 1, 8, 32>}]} {
    %c0 = arith.constant 0 : index
    %c0_0 = arith.constant 0 : index
    %c0_1 = arith.constant 0 : index
    %0 = vector.load %arg1[%c0, %c0_0, %c0_1] : memref<1x8x32xbf16, #tpu.memory_space<vmem>>, vector<1x8x32xbf16>
    %1 = vector.shape_cast %0 : vector<1x8x32xbf16> to vector<8x32xbf16>
    %2 = arith.extf %1 : vector<8x32xbf16> to vector<8x32xf32>
    %c0_2 = arith.constant 0 : index
    %c0_3 = arith.constant 0 : index
    %3 = vector.load %arg2[%c0_2, %c0_3] : memref<1x32xf32, #tpu.memory_space<vmem>>, vector<1x32xf32>
    %c0_4 = arith.constant 0 : index
    %c0_5 = arith.constant 0 : index
    %4 = vector.load %arg3[%c0_4, %c0_5] : memref<1x32xf32, #tpu.memory_space<vmem>>, vector<1x32xf32>
    %cst = arith.constant dense<0.000000e+00> : vector<8xf32>
    %5 = vector.multi_reduction <add>, %2, %cst [1] : vector<8x32xf32> to vector<8xf32>
    %6 = vector.shape_cast %5 : vector<8xf32> to vector<8x1xf32>
    %cst_6 = arith.constant 3.200000e+01 : f32
    %7 = vector.broadcast %cst_6 : f32 to vector<8x1xf32>
    %8 = arith.divf %6, %7 : vector<8x1xf32>
    %9 = vector.broadcast %8 : vector<8x1xf32> to vector<8x32xf32>
    %10 = arith.subf %2, %9 : vector<8x32xf32>
    %11 = arith.mulf %10, %10 : vector<8x32xf32>
    %cst_7 = arith.constant dense<0.000000e+00> : vector<8xf32>
    %12 = vector.multi_reduction <add>, %11, %cst_7 [1] : vector<8x32xf32> to vector<8xf32>
    %13 = vector.shape_cast %12 : vector<8xf32> to vector<8x1xf32>
    %cst_8 = arith.constant 3.200000e+01 : f32
    %14 = vector.broadcast %cst_8 : f32 to vector<8x1xf32>
    %15 = arith.divf %13, %14 : vector<8x1xf32>
    %16 = vector.broadcast %8 : vector<8x1xf32> to vector<8x32xf32>
    %17 = arith.subf %2, %16 : vector<8x32xf32>
    %cst_9 = arith.constant 9.99999974E-6 : f32
    %18 = vector.broadcast %cst_9 : f32 to vector<8x1xf32>
    %19 = arith.addf %15, %18 : vector<8x1xf32>
    %20 = math.rsqrt %19 : vector<8x1xf32>
    %21 = vector.broadcast %20 : vector<8x1xf32> to vector<8x32xf32>
    %22 = arith.mulf %17, %21 : vector<8x32xf32>
    %23 = vector.broadcast %3 : vector<1x32xf32> to vector<8x32xf32>
    %24 = arith.mulf %22, %23 : vector<8x32xf32>
    %25 = vector.broadcast %4 : vector<1x32xf32> to vector<8x32xf32>
    %26 = arith.addf %24, %25 : vector<8x32xf32>
    %27 = arith.truncf %26 : vector<8x32xf32> to vector<8x32xbf16>
    %c0_10 = arith.constant 0 : index
    %c0_11 = arith.constant 0 : index
    %28 = vector.load %arg4[%c0_10, %c0_11] : memref<32x32xbf16, #tpu.memory_space<vmem>>, vector<32x32xbf16>
    %cst_12 = arith.constant dense<0.000000e+00> : vector<8x32xf32>
    %29 = tpu.matmul %27, %28, %cst_12 {dimension_numbers = #tpu.dot_dimension_numbers<[1], [0], [0], [1], [0, 0, 1, 1], [], []>} : vector<8x32xbf16>, vector<32x32xbf16>, vector<8x32xf32> -> vector<8x32xf32>
    %c0_13 = arith.constant 0 : index
    %c0_14 = arith.constant 0 : index
    %30 = vector.load %arg7[%c0_13, %c0_14] : memref<1x32xf32, #tpu.memory_space<vmem>>, vector<1x32xf32>
    %31 = vector.broadcast %30 : vector<1x32xf32> to vector<8x32xf32>
    %32 = arith.addf %29, %31 : vector<8x32xf32>
    %33 = vector.extract_strided_slice %32 {offsets = [0, 0], sizes = [8, 16], strides = [1, 1]} : vector<8x32xf32> to vector<8x16xf32>
    %34 = vector.extract_strided_slice %32 {offsets = [0, 16], sizes = [8, 16], strides = [1, 1]} : vector<8x32xf32> to vector<8x16xf32>
    %35 = vector.shape_cast %33 : vector<8x16xf32> to vector<1x8x16xf32>
    %36 = vector.shape_cast %34 : vector<8x16xf32> to vector<1x8x16xf32>
    %37 = tpu.concatenate %35, %36 in 0 : vector<1x8x16xf32>, vector<1x8x16xf32> -> vector<2x8x16xf32>
    %38 = arith.truncf %37 : vector<2x8x16xf32> to vector<2x8x16xbf16>
    %c0_15 = arith.constant 0 : index
    %c0_16 = arith.constant 0 : index
    %39 = vector.load %arg5[%c0_15, %c0_16] : memref<32x32xbf16, #tpu.memory_space<vmem>>, vector<32x32xbf16>
    %cst_17 = arith.constant dense<0.000000e+00> : vector<8x32xf32>
    %40 = tpu.matmul %27, %39, %cst_17 {dimension_numbers = #tpu.dot_dimension_numbers<[1], [0], [0], [1], [0, 0, 1, 1], [], []>} : vector<8x32xbf16>, vector<32x32xbf16>, vector<8x32xf32> -> vector<8x32xf32>
    %c0_18 = arith.constant 0 : index
    %c0_19 = arith.constant 0 : index
    %41 = vector.load %arg8[%c0_18, %c0_19] : memref<1x32xf32, #tpu.memory_space<vmem>>, vector<1x32xf32>
    %42 = vector.broadcast %41 : vector<1x32xf32> to vector<8x32xf32>
    %43 = arith.addf %40, %42 : vector<8x32xf32>
    %44 = vector.extract_strided_slice %43 {offsets = [0, 0], sizes = [8, 16], strides = [1, 1]} : vector<8x32xf32> to vector<8x16xf32>
    %45 = vector.extract_strided_slice %43 {offsets = [0, 16], sizes = [8, 16], strides = [1, 1]} : vector<8x32xf32> to vector<8x16xf32>
    %46 = vector.shape_cast %44 : vector<8x16xf32> to vector<1x8x16xf32>
    %47 = vector.shape_cast %45 : vector<8x16xf32> to vector<1x8x16xf32>
    %48 = tpu.concatenate %46, %47 in 0 : vector<1x8x16xf32>, vector<1x8x16xf32> -> vector<2x8x16xf32>
    %49 = arith.truncf %48 : vector<2x8x16xf32> to vector<2x8x16xbf16>
    %c0_20 = arith.constant 0 : index
    %c0_21 = arith.constant 0 : index
    %50 = vector.load %arg6[%c0_20, %c0_21] : memref<32x32xbf16, #tpu.memory_space<vmem>>, vector<32x32xbf16>
    %cst_22 = arith.constant dense<0.000000e+00> : vector<8x32xf32>
    %51 = tpu.matmul %27, %50, %cst_22 {dimension_numbers = #tpu.dot_dimension_numbers<[1], [0], [0], [1], [0, 0, 1, 1], [], []>} : vector<8x32xbf16>, vector<32x32xbf16>, vector<8x32xf32> -> vector<8x32xf32>
    %c0_23 = arith.constant 0 : index
    %c0_24 = arith.constant 0 : index
    %52 = vector.load %arg9[%c0_23, %c0_24] : memref<1x32xf32, #tpu.memory_space<vmem>>, vector<1x32xf32>
    %53 = vector.broadcast %52 : vector<1x32xf32> to vector<8x32xf32>
    %54 = arith.addf %51, %53 : vector<8x32xf32>
    %55 = vector.extract_strided_slice %54 {offsets = [0, 0], sizes = [8, 16], strides = [1, 1]} : vector<8x32xf32> to vector<8x16xf32>
    %56 = vector.extract_strided_slice %54 {offsets = [0, 16], sizes = [8, 16], strides = [1, 1]} : vector<8x32xf32> to vector<8x16xf32>
    %57 = vector.shape_cast %55 : vector<8x16xf32> to vector<1x8x16xf32>
    %58 = vector.shape_cast %56 : vector<8x16xf32> to vector<1x8x16xf32>
    %59 = tpu.concatenate %57, %58 in 0 : vector<1x8x16xf32>, vector<1x8x16xf32> -> vector<2x8x16xf32>
    %60 = arith.truncf %59 : vector<2x8x16xf32> to vector<2x8x16xbf16>
    %cst_25 = arith.constant -1.000000e+30 : f32
    %61 = vector.broadcast %cst_25 : f32 to vector<2x8x1xf32>
    %cst_26 = arith.constant 0.000000e+00 : f32
    %62 = vector.broadcast %cst_26 : f32 to vector<2x8x1xf32>
    %cst_27 = arith.constant 0.000000e+00 : f32
    %63 = vector.broadcast %cst_27 : f32 to vector<2x8x16xf32>
    "tpu.trace_start"() <{level = 10 : i32, message = "hqd,hkd->hqk"}> : () -> ()
    %cst_28 = arith.constant dense<0.000000e+00> : vector<2x8x8xf32>
    %64 = tpu.matmul %38, %49, %cst_28 {dimension_numbers = #tpu.dot_dimension_numbers<[2], [2], [1], [1], [0, 0, 0, 1, 1, 1], [0], [0]>} : vector<2x8x16xbf16>, vector<2x8x16xbf16>, vector<2x8x8xf32> -> vector<2x8x8xf32>
    "tpu.trace_stop"() : () -> ()
    %cst_29 = arith.constant 2.500000e-01 : f32
    %65 = vector.broadcast %cst_29 : f32 to vector<2x8x8xf32>
    %66 = arith.mulf %64, %65 : vector<2x8x8xf32>
    %67 = tpu.iota {dimensions = array<i32: 0>} : vector<8x8xi32>
    %68 = tpu.iota {dimensions = array<i32: 1>} : vector<8x8xi32>
    %69 = arith.cmpi sge, %67, %68 : vector<8x8xi32>
    %70 = vector.shape_cast %69 : vector<8x8xi1> to vector<1x8x8xi1>
    %cst_30 = arith.constant -1.000000e+30 : f32
    %71 = vector.shape_cast %70 : vector<1x8x8xi1> to vector<1x8x8xi1>
    %72 = vector.broadcast %71 : vector<1x8x8xi1> to vector<2x8x8xi1>
    %73 = vector.broadcast %cst_30 : f32 to vector<2x8x8xf32>
    %74 = arith.select %72, %66, %73 : vector<2x8x8xi1>, vector<2x8x8xf32>
    %cst_31 = arith.constant dense<0xFF800000> : vector<2x8xf32>
    %75 = vector.multi_reduction <maximumf>, %74, %cst_31 [2] : vector<2x8x8xf32> to vector<2x8xf32>
    %76 = vector.shape_cast %75 : vector<2x8xf32> to vector<2x8x1xf32>
    %77 = arith.maximumf %61, %76 : vector<2x8x1xf32>
    %78 = arith.subf %61, %77 : vector<2x8x1xf32>
    %79 = math.exp %78 : vector<2x8x1xf32>
    %80 = vector.broadcast %77 : vector<2x8x1xf32> to vector<2x8x8xf32>
    %81 = arith.subf %74, %80 : vector<2x8x8xf32>
    %82 = math.exp %81 : vector<2x8x8xf32>
    %83 = arith.mulf %79, %62 : vector<2x8x1xf32>
    %cst_32 = arith.constant dense<0.000000e+00> : vector<2x8xf32>
    %84 = vector.multi_reduction <add>, %82, %cst_32 [2] : vector<2x8x8xf32> to vector<2x8xf32>
    %85 = vector.shape_cast %84 : vector<2x8xf32> to vector<2x8x1xf32>
    %86 = arith.addf %83, %85 : vector<2x8x1xf32>
    %87 = vector.broadcast %79 : vector<2x8x1xf32> to vector<2x8x16xf32>
    %88 = arith.mulf %87, %63 : vector<2x8x16xf32>
    %89 = arith.truncf %82 : vector<2x8x8xf32> to vector<2x8x8xbf16>
    "tpu.trace_start"() <{level = 10 : i32, message = "hqk,hkd->hqd"}> : () -> ()
    %cst_33 = arith.constant dense<0.000000e+00> : vector<2x8x16xf32>
    %90 = tpu.matmul %89, %60, %cst_33 {dimension_numbers = #tpu.dot_dimension_numbers<[2], [1], [1], [2], [0, 0, 0, 1, 1, 2], [0], [0]>} : vector<2x8x8xbf16>, vector<2x8x16xbf16>, vector<2x8x16xf32> -> vector<2x8x16xf32>
    "tpu.trace_stop"() : () -> ()
    %91 = arith.addf %88, %90 : vector<2x8x16xf32>
    %92 = tpu.reciprocal %86 {approx = true} : vector<2x8x1xf32> -> vector<2x8x1xf32>
    %93 = vector.broadcast %92 : vector<2x8x1xf32> to vector<2x8x16xf32>
    %94 = arith.mulf %91, %93 : vector<2x8x16xf32>
    %cst_34 = arith.constant 0.000000e+00 : f32
    %95 = vector.broadcast %cst_34 : f32 to vector<8x32xf32>
    %96 = vector.extract_strided_slice %94 {offsets = [0, 0, 0], sizes = [1, 8, 16], strides = [1, 1, 1]} : vector<2x8x16xf32> to vector<1x8x16xf32>
    %97 = vector.shape_cast %96 : vector<1x8x16xf32> to vector<8x16xf32>
    %98 = arith.truncf %97 : vector<8x16xf32> to vector<8x16xbf16>
    %c0_35 = arith.constant 0 : index
    %c0_36 = arith.constant 0 : index
    %99 = vector.load %arg10[%c0_35, %c0_36] : memref<32x32xbf16, #tpu.memory_space<vmem>>, vector<16x32xbf16>
    %cst_37 = arith.constant dense<0.000000e+00> : vector<8x32xf32>
    %100 = tpu.matmul %98, %99, %cst_37 {dimension_numbers = #tpu.dot_dimension_numbers<[1], [0], [0], [1], [0, 0, 1, 1], [], []>} : vector<8x16xbf16>, vector<16x32xbf16>, vector<8x32xf32> -> vector<8x32xf32>
    %101 = arith.addf %95, %100 : vector<8x32xf32>
    %102 = vector.extract_strided_slice %94 {offsets = [1, 0, 0], sizes = [1, 8, 16], strides = [1, 1, 1]} : vector<2x8x16xf32> to vector<1x8x16xf32>
    %103 = vector.shape_cast %102 : vector<1x8x16xf32> to vector<8x16xf32>
    %104 = arith.truncf %103 : vector<8x16xf32> to vector<8x16xbf16>
    %c16 = arith.constant 16 : index
    %c0_38 = arith.constant 0 : index
    %105 = vector.load %arg10[%c16, %c0_38] : memref<32x32xbf16, #tpu.memory_space<vmem>>, vector<16x32xbf16>
    %cst_39 = arith.constant dense<0.000000e+00> : vector<8x32xf32>
    %106 = tpu.matmul %104, %105, %cst_39 {dimension_numbers = #tpu.dot_dimension_numbers<[1], [0], [0], [1], [0, 0, 1, 1], [], []>} : vector<8x16xbf16>, vector<16x32xbf16>, vector<8x32xf32> -> vector<8x32xf32>
    %107 = arith.addf %101, %106 : vector<8x32xf32>
    %108 = arith.addf %2, %107 : vector<8x32xf32>
    %c0_40 = arith.constant 0 : index
    %c0_41 = arith.constant 0 : index
    %109 = vector.load %arg11[%c0_40, %c0_41] : memref<1x32xf32, #tpu.memory_space<vmem>>, vector<1x32xf32>
    %110 = vector.broadcast %109 : vector<1x32xf32> to vector<8x32xf32>
    %111 = arith.addf %108, %110 : vector<8x32xf32>
    %c0_42 = arith.constant 0 : index
    %c0_43 = arith.constant 0 : index
    %112 = vector.load %arg12[%c0_42, %c0_43] : memref<1x32xf32, #tpu.memory_space<vmem>>, vector<1x32xf32>
    %c0_44 = arith.constant 0 : index
    %c0_45 = arith.constant 0 : index
    %113 = vector.load %arg13[%c0_44, %c0_45] : memref<1x32xf32, #tpu.memory_space<vmem>>, vector<1x32xf32>
    %cst_46 = arith.constant dense<0.000000e+00> : vector<8xf32>
    %114 = vector.multi_reduction <add>, %111, %cst_46 [1] : vector<8x32xf32> to vector<8xf32>
    %115 = vector.shape_cast %114 : vector<8xf32> to vector<8x1xf32>
    %cst_47 = arith.constant 3.200000e+01 : f32
    %116 = vector.broadcast %cst_47 : f32 to vector<8x1xf32>
    %117 = arith.divf %115, %116 : vector<8x1xf32>
    %118 = vector.broadcast %117 : vector<8x1xf32> to vector<8x32xf32>
    %119 = arith.subf %111, %118 : vector<8x32xf32>
    %120 = arith.mulf %119, %119 : vector<8x32xf32>
    %cst_48 = arith.constant dense<0.000000e+00> : vector<8xf32>
    %121 = vector.multi_reduction <add>, %120, %cst_48 [1] : vector<8x32xf32> to vector<8xf32>
    %122 = vector.shape_cast %121 : vector<8xf32> to vector<8x1xf32>
    %cst_49 = arith.constant 3.200000e+01 : f32
    %123 = vector.broadcast %cst_49 : f32 to vector<8x1xf32>
    %124 = arith.divf %122, %123 : vector<8x1xf32>
    %125 = vector.broadcast %117 : vector<8x1xf32> to vector<8x32xf32>
    %126 = arith.subf %111, %125 : vector<8x32xf32>
    %cst_50 = arith.constant 9.99999974E-6 : f32
    %127 = vector.broadcast %cst_50 : f32 to vector<8x1xf32>
    %128 = arith.addf %124, %127 : vector<8x1xf32>
    %129 = math.rsqrt %128 : vector<8x1xf32>
    %130 = vector.broadcast %129 : vector<8x1xf32> to vector<8x32xf32>
    %131 = arith.mulf %126, %130 : vector<8x32xf32>
    %132 = vector.broadcast %112 : vector<1x32xf32> to vector<8x32xf32>
    %133 = arith.mulf %131, %132 : vector<8x32xf32>
    %134 = vector.broadcast %113 : vector<1x32xf32> to vector<8x32xf32>
    %135 = arith.addf %133, %134 : vector<8x32xf32>
    %136 = arith.truncf %135 : vector<8x32xf32> to vector<8x32xbf16>
    %cst_51 = arith.constant 0.000000e+00 : f32
    %137 = vector.broadcast %cst_51 : f32 to vector<8x32xf32>
    %c0_52 = arith.constant 0 : index
    %c0_53 = arith.constant 0 : index
    %138 = vector.load %arg14[%c0_52, %c0_53] : memref<32x128xbf16, #tpu.memory_space<vmem>>, vector<32x128xbf16>
    %cst_54 = arith.constant dense<0.000000e+00> : vector<8x128xf32>
    %139 = tpu.matmul %136, %138, %cst_54 {dimension_numbers = #tpu.dot_dimension_numbers<[1], [0], [0], [1], [0, 0, 1, 1], [], []>} : vector<8x32xbf16>, vector<32x128xbf16>, vector<8x128xf32> -> vector<8x128xf32>
    %c0_55 = arith.constant 0 : index
    %c0_56 = arith.constant 0 : index
    %140 = vector.load %arg15[%c0_55, %c0_56] : memref<1x128xf32, #tpu.memory_space<vmem>>, vector<1x128xf32>
    %141 = vector.broadcast %140 : vector<1x128xf32> to vector<8x128xf32>
    %142 = arith.addf %139, %141 : vector<8x128xf32>
    %cst_57 = arith.constant 5.000000e-01 : f32
    %143 = vector.broadcast %cst_57 : f32 to vector<8x128xf32>
    %144 = arith.mulf %143, %142 : vector<8x128xf32>
    %cst_58 = arith.constant 4.471500e-02 : f32
    %145 = vector.broadcast %cst_58 : f32 to vector<8x128xf32>
    %146 = arith.mulf %145, %142 : vector<8x128xf32>
    %147 = arith.mulf %146, %142 : vector<8x128xf32>
    %148 = arith.mulf %147, %142 : vector<8x128xf32>
    %149 = arith.addf %142, %148 : vector<8x128xf32>
    %cst_59 = arith.constant 0.797884583 : f32
    %150 = vector.broadcast %cst_59 : f32 to vector<8x128xf32>
    %151 = arith.mulf %150, %149 : vector<8x128xf32>
    %152 = math.tanh %151 : vector<8x128xf32>
    %cst_60 = arith.constant 1.000000e+00 : f32
    %153 = vector.broadcast %cst_60 : f32 to vector<8x128xf32>
    %154 = arith.addf %153, %152 : vector<8x128xf32>
    %155 = arith.mulf %144, %154 : vector<8x128xf32>
    %156 = arith.truncf %155 : vector<8x128xf32> to vector<8x128xbf16>
    %c0_61 = arith.constant 0 : index
    %c0_62 = arith.constant 0 : index
    %157 = vector.load %arg16[%c0_61, %c0_62] : memref<128x32xbf16, #tpu.memory_space<vmem>>, vector<128x32xbf16>
    %cst_63 = arith.constant dense<0.000000e+00> : vector<8x32xf32>
    %158 = tpu.matmul %156, %157, %cst_63 {dimension_numbers = #tpu.dot_dimension_numbers<[1], [0], [0], [1], [0, 0, 1, 1], [], []>} : vector<8x128xbf16>, vector<128x32xbf16>, vector<8x32xf32> -> vector<8x32xf32>
    %159 = arith.addf %137, %158 : vector<8x32xf32>
    %c0_64 = arith.constant 0 : index
    %c0_65 = arith.constant 0 : index
    %160 = vector.load %arg17[%c0_64, %c0_65] : memref<1x32xf32, #tpu.memory_space<vmem>>, vector<1x32xf32>
    %161 = vector.broadcast %160 : vector<1x32xf32> to vector<8x32xf32>
    %162 = arith.addf %159, %161 : vector<8x32xf32>
    %163 = arith.addf %111, %162 : vector<8x32xf32>
    %164 = arith.truncf %163 : vector<8x32xf32> to vector<8x32xbf16>
    %c0_66 = arith.constant 0 : index
    %c0_67 = arith.constant 0 : index
    %c0_68 = arith.constant 0 : index
    %165 = vector.load %arg18[%c0_66, %c0_67, %c0_68] : memref<1x8x32xbf16, #tpu.memory_space<vmem>>, vector<1x8x32xbf16>
    %166 = vector.shape_cast %165 : vector<1x8x32xbf16> to vector<8x32xbf16>
    %167 = vector.shape_cast %164 : vector<8x32xbf16> to vector<1x8x32xbf16>
    tpu.vector_store %arg18[%c0_66, %c0_67, %c0_68], %167 {strides = array<i32>} : memref<1x8x32xbf16, #tpu.memory_space<vmem>>, vector<1x8x32xbf16>,
    return
  }
  func.func @transform_0(%arg0: i32) -> (i32, i32, i32) {
    %c0_i32 = arith.constant 0 : i32
    %c0_i32_0 = arith.constant 0 : i32
    %c0_i32_1 = arith.constant 0 : i32
    return %arg0, %c0_i32, %c0_i32_0 : i32, i32, i32
  }
  func.func @transform_1(%arg0: i32) -> (i32, i32) {
    %c0_i32 = arith.constant 0 : i32
    %c0_i32_0 = arith.constant 0 : i32
    %c0_i32_1 = arith.constant 0 : i32
    return %c0_i32, %c0_i32_0 : i32, i32
  }
  func.func @transform_2(%arg0: i32) -> (i32, i32) {
    %c0_i32 = arith.constant 0 : i32
    %c0_i32_0 = arith.constant 0 : i32
    %c0_i32_1 = arith.constant 0 : i32
    return %c0_i32, %c0_i32_0 : i32, i32
  }
  func.func @transform_3(%arg0: i32) -> (i32, i32) {
    %c0_i32 = arith.constant 0 : i32
    %c0_i32_0 = arith.constant 0 : i32
    %c0_i32_1 = arith.constant 0 : i32
    return %c0_i32, %c0_i32_0 : i32, i32
  }
  func.func @transform_4(%arg0: i32) -> (i32, i32) {
    %c0_i32 = arith.constant 0 : i32
    %c0_i32_0 = arith.constant 0 : i32
    %c0_i32_1 = arith.constant 0 : i32
    return %c0_i32, %c0_i32_0 : i32, i32
  }
  func.func @transform_5(%arg0: i32) -> (i32, i32) {
    %c0_i32 = arith.constant 0 : i32
    %c0_i32_0 = arith.constant 0 : i32
    %c0_i32_1 = arith.constant 0 : i32
    return %c0_i32, %c0_i32_0 : i32, i32
  }
  func.func @transform_6(%arg0: i32) -> (i32, i32) {
    %c0_i32 = arith.constant 0 : i32
    %c0_i32_0 = arith.constant 0 : i32
    %c0_i32_1 = arith.constant 0 : i32
    return %c0_i32, %c0_i32_0 : i32, i32
  }
  func.func @transform_7(%arg0: i32) -> (i32, i32) {
    %c0_i32 = arith.constant 0 : i32
    %c0_i32_0 = arith.constant 0 : i32
    %c0_i32_1 = arith.constant 0 : i32
    return %c0_i32, %c0_i32_0 : i32, i32
  }
  func.func @transform_8(%arg0: i32) -> (i32, i32) {
    %c0_i32 = arith.constant 0 : i32
    %c0_i32_0 = arith.constant 0 : i32
    %c0_i32_1 = arith.constant 0 : i32
    return %c0_i32, %c0_i32_0 : i32, i32
  }
  func.func @transform_9(%arg0: i32) -> (i32, i32) {
    %c0_i32 = arith.constant 0 : i32
    %c0_i32_0 = arith.constant 0 : i32
    %c0_i32_1 = arith.constant 0 : i32
    return %c0_i32, %c0_i32_0 : i32, i32
  }
  func.func @transform_10(%arg0: i32) -> (i32, i32) {
    %c0_i32 = arith.constant 0 : i32
    %c0_i32_0 = arith.constant 0 : i32
    %c0_i32_1 = arith.constant 0 : i32
    return %c0_i32, %c0_i32_0 : i32, i32
  }
  func.func @transform_11(%arg0: i32) -> (i32, i32) {
    %c0_i32 = arith.constant 0 : i32
    %c0_i32_0 = arith.constant 0 : i32
    %c0_i32_1 = arith.constant 0 : i32
    return %c0_i32, %c0_i32_0 : i32, i32
  }
  func.func @transform_12(%arg0: i32) -> (i32, i32) {
    %c0_i32 = arith.constant 0 : i32
    %c0_i32_0 = arith.constant 0 : i32
    %c0_i32_1 = arith.constant 0 : i32
    return %c0_i32, %c0_i32_0 : i32, i32
  }
  func.func @transform_13(%arg0: i32) -> (i32, i32) {
    %c0_i32 = arith.constant 0 : i32
    %c0_i32_0 = arith.constant 0 : i32
    %c0_i32_1 = arith.constant 0 : i32
    return %c0_i32, %c0_i32_0 : i32, i32
  }
  func.func @transform_14(%arg0: i32) -> (i32, i32) {
    %c0_i32 = arith.constant 0 : i32
    %c0_i32_0 = arith.constant 0 : i32
    %c0_i32_1 = arith.constant 0 : i32
    return %c0_i32, %c0_i32_0 : i32, i32
  }
  func.func @transform_15(%arg0: i32) -> (i32, i32) {
    %c0_i32 = arith.constant 0 : i32
    %c0_i32_0 = arith.constant 0 : i32
    %c0_i32_1 = arith.constant 0 : i32
    return %c0_i32, %c0_i32_0 : i32, i32
  }
  func.func @transform_16(%arg0: i32) -> (i32, i32) {
    %c0_i32 = arith.constant 0 : i32
    %c0_i32_0 = arith.constant 0 : i32
    %c0_i32_1 = arith.constant 0 : i32
    return %c0_i32, %c0_i32_0 : i32, i32
  }
  func.func @transform_17(%arg0: i32) -> (i32, i32, i32) {
    %c0_i32 = arith.constant 0 : i32
    %c0_i32_0 = arith.constant 0 : i32
    %c0_i32_1 = arith.constant 0 : i32
    return %arg0, %c0_i32, %c0_i32_0 : i32, i32, i32
  }
}

</mosaic_0001>

<bundles_post_ra>
// kernel: tpu_custom_call.1
= control target key start
LH: loop header
LB: loop body
LE: loop exit
PB: predicated region body
PF: predicated region fallthrough
CT: control target
= control target key end

     0   :  { %s2222_s0 = inlined_call_operand.hbm [shape: bf16[2,8,32], index: 0, kind: input, shape index: {}]   ;;  %s2223_s1 = inlined_call_operand.vmem [shape: f32[1,32], index: 1, kind: input, shape index: {}]   ;;  %s2224_s2 = inlined_call_operand.vmem [shape: f32[1,32], index: 2, kind: input, shape index: {}]   ;;  %s2225_s3 = inlined_call_operand.vmem [shape: bf16[32,32], index: 3, kind: input, shape index: {}]   ;;  %s2226_s4 = inlined_call_operand.vmem [shape: bf16[32,32], index: 4, kind: input, shape index: {}]   ;;  %s2227_s5 = inlined_call_operand.vmem [shape: bf16[32,32], index: 5, kind: input, shape index: {}]   ;;  %s2228_s6 = inlined_call_operand.vmem [shape: f32[1,32], index: 6, kind: input, shape index: {}]   ;;  %s2229_s7 = inlined_call_operand.vmem [shape: f32[1,32], index: 7, kind: input, shape index: {}]   ;;  %s2230_s8 = inlined_call_operand.vmem [shape: f32[1,32], index: 8, kind: input, shape index: {}]   ;;  %s2231_s9 = inlined_call_operand.vmem [shape: bf16[32,32], index: 9, kind: input, shape index: {}]   ;;  %s2232_s10 = inlined_call_operand.vmem [shape: f32[1,32], index: 10, kind: input, shape index: {}]   ;;  %s2233_s11 = inlined_call_operand.vmem [shape: f32[1,32], index: 11, kind: input, shape index: {}]   ;;  %s2234_s12 = inlined_call_operand.vmem [shape: f32[1,32], index: 12, kind: input, shape index: {}]   ;;  %s2235_s13 = inlined_call_operand.vmem [shape: bf16[32,128], index: 13, kind: input, shape index: {}]   ;;  %s2236_s14 = inlined_call_operand.vmem [shape: f32[1,128], index: 14, kind: input, shape index: {}]   ;;  %s2237_s15 = inlined_call_operand.vmem [shape: bf16[128,32], index: 15, kind: input, shape index: {}]   ;;  %s2238_s16 = inlined_call_operand.vmem [shape: f32[1,32], index: 16, kind: input, shape index: {}]   ;;  %s2239_s17 = inlined_call_operand.hbm [shape: bf16[2,8,32], index: 17, kind: output, shape index: {}]  }
   0x1   :  { %2252 = sst [smem:[#allocation15_spill]] %s2222_s0 }
   0x2   :  { %2253 = sst [smem:[#allocation16_spill]] %s2223_s1 }
   0x3   :  { %2254 = sst [smem:[#allocation17_spill]] %s2238_s16 }
   0x4   :  { %2255 = sst [smem:[#allocation18_spill]] %s2239_s17 }
   0x5   :  { %22 = vsyncpa [#allocation3], 0 }
   0x6   :  { %24 = vsyncpa [#allocation3 + $0x1], 0 }
   0x7   :  { %25 = vsyncpa [#allocation4], 0 }
   0x8   :  { %27 = vsyncpa [#allocation4 + $0x1], 0  ;;  %s1908_s24 = smov 0   ;;  %s1910_s25 = smov 0  }
   0x9   :  { %s1912_s26 = smov 0   ;;  %s1914_s27 = smov 0  }
   0xa LB: > { %2256 = sst [smem:[#allocation8_spill]] %s1799_s24  ;;  %s1929_s28 = sadd.s32 4294967295, %s1811_s27   ;;  %s1811_s27 = sphi %s1914_s27, %s2283_s27   ;;  %s1807_s26 = sphi %s1912_s26, %s2288_s26   ;;  %s1803_s25 = sphi %s1910_s25, %s2287_s25   ;;  %s1799_s24 = sphi %s1908_s24, %s2286_s24  }
   0xb   : > { %2257 = sst [smem:[#allocation9_spill]] %s1807_s26  ;;  %s1463_s29 = sadd.s32 4294967294, %s1811_s27  }
   0xc   : > { %2258 = sst [smem:[#allocation10_spill]] %s1929_s28  ;;  %s1933_s0 = sadd.s32 1, %s1811_s27  }
   0xd   : > { %2259 = sst [smem:[#allocation11_spill]] %s1933_s0  ;;  %s40_s30 = sadd.s32 1, %s1807_s26 }
   0xe   : > { %s37_s18 = ssub.s32 %s1811_s27, %s1933_s0  ;;  %p47_p0 = scmp.ne.s32.totalorder %s1807_s26, %s1803_s25 }
   0xf   : > { %p38_p1 = scmp.eq.s32.totalorder %s37_s18, 0  ;;  %p48_p2 = scmp.eq.s32.totalorder %s1811_s27, 0 }
  0x10   : > { %p53_p3 = scmp.ne.s32.totalorder %s1803_s25, %s1799_s24  ;;  %p54_p4 = scmp.eq.s32.totalorder %s1929_s28, 0 }
  0x11   : > { %s1945_s19 = scalar_select %p38_p1, %s1807_s26, %s40_s30  }
  0x12   : > { %p1947_p5 = por %p48_p2, %p47_p0  ;;  %p1951_p6 = por %p54_p4, %p53_p3 }
  0x13   : > { %2260 = sst [smem:[#allocation12_spill]] %s1945_s19  ;;  %p413_p7 = scmp.eq.s32.totalorder %s1929_s28, 1 }
  0x14   : > { %s2262_s20 = scalar_select %p1951_p6, 1, 0 }
  0x15   : > { %p419_p8 = scmp.eq.s32.totalorder %s1463_s29, 1  ;;  %p1646_p10 = scmp.lt.s32.totalorder %s1811_s27, 2 }
  0x16   : > { %p1958_p11 = por %p413_p7, %p47_p0  ;;  %s487_s23 = sand.u32 1, %s1807_s26  }
  0x17   : > { %p1962_p12 = por %p419_p8, %p53_p3  ;;  %s1467_s30 = sshll.u32 %s1811_s27, 6 }
  0x18   : > { %s2263_s21 = scalar_select %p1958_p11, 1, 0 }
  0x19   : > { %s2265_s22 = scalar_select %p1962_p12, 1, 0 }
  0x1a   : > { %2264 = sst [smem:[#allocation13_spill]] %s2263_s21  ;;  %s1466_s18 = sshll.u32 %s487_s23, 2 }
  0x1b   : > { %2266 = sst [smem:[#allocation14_spill]] %s2265_s22  ;;  %s491_s29 = scalar_lea.vmem [#allocation2], %s1466_s18 }
  0x1c   : > { %s2267_s24 = sld [smem:[#allocation15_spill]]  ;;  %s498_s28 = sshll.u32 %s491_s29, 4  ;;  %s1979_s28 = int_to_ptr.vmem [resolvable:$true] %s498_s28 }
  0x1d   : > { %p1975_p13 = pnand %p1646_p10, %p1947_p5  ;;  %s488_s26 = scalar_lea.sflag [#allocation3], %s487_s23 }
  0x1f   : > { %p1721_p3 = pneg %p1975_p13 }
  0x22   : > { %s2268_s17 = smov %s2267_s24  ;;  %s1971_s16 = scalar_lea.hbm %s2267_s24, %s1467_s30 }
  0x23   : > { %s1719_s22 = scalar_lea.hbm %s1971_s16, 64  ;;  %s1724_s19 = scalar_lea.hbm %s2268_s17, 128 }
  0x24   : > { %p1720_p2 = scmp.ne.s32.totalorder %s1971_s16, %s1719_s22  ;;  %p1725_p5 = scmp.lt.s32.totalorder %s1971_s16, %s2268_s17 }
  0x25   : > { %p1726_p8 = scmp.lt.s32.totalorder %s1724_s19, %s1719_s22 }
  0x26   : > { %p1722_p4 = pnand %p1721_p3, %p1720_p2 }
  0x27   : > { %p1727_p10 = por %p1726_p8, %p1725_p5 }
  0x28   : > { %p1723_p7 = pneg %p1722_p4 }
  0x2a   : > { %p1728_p9 = pnand %p1727_p10, %p1723_p7 }
  0x2c   : > { %1731 = shalt.err (!%p1728_p9)
}
  0x2d   : > { %s1732_s23 = scalar_lea.vmem %s1979_s28, 64  ;;  %s1813_s18 = smov [#allocation2]  }
  0x2e   : > { %p1733_p0 = scmp.ne.s32.totalorder %s1979_s28, %s1732_s23  ;;  %s1737_s29 = sshll.u32 %s1813_s18, 4  ;;  %s1738_s29 = int_to_ptr.vmem [resolvable:$false] %s1737_s29 }
  0x2f   : > { %s1739_s24 = scalar_lea.vmem %s1738_s29, 128  ;;  %p1740_p4 = scmp.lt.s32.totalorder %s1979_s28, %s1738_s29 }
  0x30   : > { %p1735_p1 = pnand %p1733_p0, %p1721_p3  ;;  %p1741_p12 = scmp.lt.s32.totalorder %s1739_s24, %s1732_s23 }
  0x32   : > { %p1736_p2 = pneg %p1735_p1  ;;  %p1742_p11 = por %p1741_p12, %p1740_p4 }
  0x34   : > { %p1743_p6 = pnand %p1742_p11, %p1736_p2 }
  0x36   : > { %1746 = shalt.err (!%p1743_p6)
}
  0x37   : > { %1641 = dma.hbm_to_vmem [thread:$0]  (!%p1975_p13), %s1971_s16, 64, %s1979_s28, %s488_s26  }
  0x38   : > { %p2270_p9 = scmp.lt.s32.totalorder %s1811_s27, 3  ;;  %p2271_p7 = scmp.ge.s32.totalorder %s1811_s27, 1 }
  0x3a   : > { %p504_p0 = pnand %p2271_p7, %p2270_p9 }
  0x3b   : > { %s2006_s22 = sand.u32 (!%p504_p0), 1, %s1803_s25   ;;  %p2272_p6 = scmp.ne.s32.totalorder (!%p504_p0), %s2262_s20, 0 }
  0x3c   : > { %507 = sbr.rel (%p504_p0) target bundleno = 2209 (0x8a1), region = 88  ;;  %s1469_s0 = sshll.u32 (!%p504_p0), %s2006_s22, 2 }
  0x3d   : > { %s510_s19 = scalar_lea.sflag (!%p504_p0), [#allocation3], %s2006_s22  ;;  %s513_s21 = scalar_lea.vmem (!%p504_p0), [#allocation2], %s1469_s0 }
  0x41   : > { %1790 = dma.done.wait (%p2272_p6), %s510_s19, 64  }
  0x42   : > { %1792 = vsyncadd (%p2272_p6), %s510_s19, 4294967232  ;;  %vm569_vm0 = vcmask 261120   ;;  %v565_v0 = vld [vmem:[%s513_s21] sm:$0xf]  ;;  %v1683_v8 = vld [vmem:[%s2225_s3 + $0x8] sm:$0xff]   ;;  %v1814_v9 = vmov 0.0   ;;  %v904_v53 = vlaneseq }
  0x43   : > { %v2016_v1 = vunpack.c.l.bf16 %v565_v0  ;;  %1546 = vmatprep.subr.bf16.mxu1 %v1814_v9  ;;  %vm1815_vm1 = vmmov 0   ;;  %v1684_v10 = vld [vmem:[%s2225_s3] sm:$0xff]   ;;  %1576 = vmatprep.subr.bf16.mxu0 %v1814_v9  ;;  %s2273_s23 = sld [smem:[#allocation16_spill]]  ;;  %v1685_v20 = vld [vmem:[%s2226_s4 + $0x8] sm:$0xff]   ;;  %vm809_vm2 = vcmask 130048   ;;  %s1816_s24 = smov 112  }
  0x44   : > { %1550 = vmatprep.mubr.msk.bf16.mxu1 %vm1815_vm1, %v1814_v9  ;;  %1547 = vmatpush3.bf16.msra.mxu1 %v1683_v8  ;;  %v1472_v17 = vld [vmem:[%s2224_s2] ss:$0 sm:$0xff]  ;;  %v1687_v23 = vld [vmem:[%s2227_s5 + $0x8] sm:$0xff]   ;;  %vm949_vm3 = vcmask 1043456   ;;  %v905_v54 = vshrl.u32 %v904_v53, 7  ;;  %v907_v55 = vand.u32 127, %v904_v53 }
  0x45   : > { %v570_v2 = vsel %vm569_vm0, %v2016_v1, 0.0  ;;  %1548 = vmatprep.subr.bf16.mxu1 %v1814_v9  ;;  %1578 = vmatprep.mubr.msk.bf16.mxu0 %vm1815_vm1, %v1814_v9  ;;  %v1686_v22 = vld [vmem:[%s2226_s4] sm:$0xff]   ;;  %vm913_vm5 = vcmask 64512   ;;  %s2274_s29 = sld [smem:[#allocation10_spill]]  ;;  %s563_s28 = scalar_lea.vmem [#allocation5], %s1469_s0  ;;  %vm1377_vm6 = vcmask 257024  }
  0x46   : > { %571 = vadd.xlane.f32.xlu0 %v570_v2  ;;  %v1688_v24 = vld [vmem:[%s2227_s5] sm:$0xff]   ;;  %vm908_vm4 = vcmp.ge.s32.totalorder %v905_v54, %v907_v55  ;;  %s2275_s21 = sld [smem:[#allocation17_spill]]  ;;  %s1393_s20 = sshll.u32 %s563_s28, 4  ;;  %s1394_s20 = int_to_ptr.vmem [resolvable:$true] %s1393_s20 }
  0x47   : > { %v1477_v29 = vld [vmem:[%s2229_s7] ss:$0 sm:$0xff]  ;;  %s2276_s16 = sld [smem:[#allocation13_spill]]  ;;  %s1747_s19 = scalar_lea.vmem %s1394_s20, 64 }
  0x48   : > { %1549 = vmatpush3.bf16.msra.mxu1 %v1684_v10  ;;  %v1473_v32 = vld [vmem:[%s2228_s6] ss:$0 sm:$0xff]  ;;  %p1748_p11 = scmp.ne.s32.totalorder %s1394_s20, %s1747_s19  ;;  %s1817_s0 = smov [#allocation5]  }
  0x49   : > { %1554 = vmatprep.subr.bf16.mxu1 %v1814_v9  ;;  %v1471_v15 = vld [vmem:[%s2273_s23] ss:$0 sm:$0xff]  ;;  %s2277_s23 = sld [smem:[#allocation18_spill]] }
  0x4a   : > { %v1481_v39 = vld [vmem:[%s2230_s8] ss:$0 sm:$0xff] }
  0x4b   : > { %s1510_s26 = sshll.u32 %s2274_s29, 6  ;;  %s1751_s29 = sshll.u32 %s1817_s0, 4  ;;  %s1752_s29 = int_to_ptr.vmem [resolvable:$false] %s1751_s29 }
  0x4c   : > { %p1754_p3 = scmp.lt.s32.totalorder %s1394_s20, %s1752_s29 }
  0x4d   : > { %p2278_p12 = scmp.ne.s32.totalorder %s2276_s16, 0 }
  0x4f   : > { %s2185_s18 = scalar_lea.hbm %s2277_s23, %s1510_s26  ;;  %p1749_p13 = pnand %p1748_p11, %p2278_p12 }
  0x51   : > { %p1750_p1 = pneg %p1749_p13 }
  0xcf   : > { %v572_v3 = vpop.xlane.xlu0 %571 }
  0xd0   : > { %v574_v4 = vmul.f32 0.03125, %v572_v3 }
  0xd2   : > { %v575_v5 = vsub.f32 %v2016_v1, %v574_v4 }
  0xd4   : > { %v576_v6 = vmul.f32 %v575_v5, %v575_v5 }
  0xd6   : > { %v577_v7 = vsel %vm569_vm0, %v576_v6, 0.0 }
  0xd7   : > { %578 = vadd.xlane.f32.xlu0 %v577_v7 }
 0x160   : > { %v579_v11 = vpop.xlane.xlu0 %578 }
 0x161   : > { %v580_v12 = vmul.f32 0.03125, %v579_v11 }
 0x163   : > { %v581_v13 = vadd.f32 1e-05, %v580_v12 }
 0x165   : > { %1701 = vrsqrt.f32 %v581_v13 }
 0x172   : > { %v1702_v14 = vpop.eup %1701 }
 0x173   : > { %v583_v16 = vmul.f32 %v1702_v14, %v575_v5 }
 0x175   : > { %v590_v18 = vmul.f32 %v1471_v15, %v583_v16 }
 0x177   : > { %v597_v19 = vadd.f32 %v1472_v17, %v590_v18 }
 0x179   : > { %v598_v21 = vpack.c.bf16 %v597_v19, %v597_v19 }
 0x17b   : > { %1551 = vmatmul.mubr.msk.bf16.vlgmr.msra.gmra.mxu1 %vm569_vm0, %v598_v21 }
 0x17c   : > { %1555 = vmatpush3.bf16.msra.mxu1 %v1685_v20  ;;  %1558 = vmatprep.mubr.msk.bf16.mxu1 %vm1815_vm1, %v1814_v9 }
 0x17d   : > { %1556 = vmatprep.subr.bf16.mxu1 %v1814_v9 }
 0x180   : > { %1557 = vmatpush3.bf16.msra.mxu1 %v1686_v22 }
 0x181   : > { %1562 = vmatprep.subr.bf16.mxu1 %v1814_v9 }
 0x183   : > { %1559 = vmatmul.mubr.msk.bf16.vlgmr.msra.gmra.mxu1 %vm569_vm0, %v598_v21 }
 0x184   : > { %1563 = vmatpush3.bf16.msra.mxu1 %v1687_v23  ;;  %1566 = vmatprep.mubr.msk.bf16.mxu1 %vm1815_vm1, %v1814_v9  ;;  %v1689_v23 = vld [vmem:[%s2231_s9] sm:$0xff]  }
 0x185   : > { %1564 = vmatprep.subr.bf16.mxu1 %v1814_v9 }
 0x188   : > { %1565 = vmatpush3.bf16.msra.mxu1 %v1688_v24 }
 0x189   : > { %1570 = vmatprep.subr.bf16.mxu1 %v1814_v9 }
 0x18b   : > { %1567 = vmatmul.mubr.msk.bf16.vlgmr.msra.gmra.mxu1 %vm569_vm0, %v598_v21 }
 0x18c   : > { %1572 = vmatprep.mubr.msk.bf16.mxu1 %vm1815_vm1, %v1814_v9 }
 0x23b   : > { %v659_v25 = vpop.f32.mrf.mxu1 }
 0x23c   : > { %v660_v36 = vadd.f32 %v1473_v32, %v659_v25 }
 0x23d   : > { %v1552_v26 = vpop.f32.mrf.mxu1 }
 0x23e   : > { %v669_v43 = vpack.c.bf16 %v660_v36, %v660_v36  ;;  %v1690_v26 = vld [vmem:[%s2231_s9 + $0x8] sm:$0xff]  }
 0x23f   : > { %v662_v27 = vpop.f32.mrf.mxu1 }
 0x241   : > { %v1553_v28 = vpop.f32.mrf.mxu1 }
 0x243   : > { %v728_v30 = vpop.f32.mrf.mxu1 }
 0x244   : > { %v729_v31 = vadd.f32 %v1477_v29, %v728_v30 }
 0x245   : > { %v1560_v33 = vpop.f32.mrf.mxu1 }
 0x246   : > { %v738_v34 = vpack.c.bf16 %v729_v31, %v729_v31  ;;  %735 = vrot.lane.b32.xlu1 %v729_v31, %s1816_s24 }
 0x247   : > { %v731_v35 = vpop.f32.mrf.mxu1 }
 0x248   : > { %v814_v37 = vsel %vm809_vm2, %v738_v34, 0 }
 0x249   : > { %v1561_v38 = vpop.f32.mrf.mxu1  ;;  %1571 = vmatpush3.bf16.xpose.msra.mxu1 %v814_v37 }
 0x24a   : > { %666 = vrot.lane.b32.xlu1 %v660_v36, %s1816_s24  ;;  %1582 = vmatprep.subr.bf16.mxu1 %v1814_v9 }
 0x24b   : > { %v797_v40 = vpop.f32.mrf.mxu1 }
 0x24c   : > { %v798_v41 = vadd.f32 %v1481_v39, %v797_v40 }
 0x24d   : > { %v1568_v42 = vpop.f32.mrf.mxu1 }
 0x24e   : > { %v807_v44 = vpack.c.bf16 %v798_v41, %v798_v41 }
 0x24f   : > { %v800_v45 = vpop.f32.mrf.mxu1 }
 0x250   : > { %1573 = vmatmul.mubr.msk.bf16.vlgmr.msra.gmra.mxu1 %vm809_vm2, %v669_v43  ;;  %v951_v46 = vsel %vm949_vm3, %v807_v44, 0 }
 0x251   : > { %v1569_v47 = vpop.f32.mrf.mxu1  ;;  %1583 = vmatpush3.bf16.msra.mxu1 %v951_v46  ;;  %1584 = vmatprep.mubr.msk.bf16.mxu1 %vm1815_vm1, %v1814_v9 }
 0x252   : > { %1594 = vmatprep.subr.bf16.mxu1 %v1814_v9 }
 0x2b8   : > { %v736_v48 = vpop.permute.xlu1 %735 }
 0x2b9   : > { %v739_v49 = vpack.c.bf16 %v736_v48, %v736_v48 }
 0x2bb   : > { %v860_v50 = vsel %vm809_vm2, %v739_v49, 0 }
 0x2bc   : > { %1577 = vmatpush3.bf16.xpose.msra.mxu0 %v860_v50  ;;  %v667_v51 = vpop.permute.xlu1 %666 }
 0x2bd   : > { %1588 = vmatprep.subr.bf16.mxu0 %v1814_v9  ;;  %v670_v52 = vpack.c.bf16 %v667_v51, %v667_v51 }
 0x2c3   : > { %1579 = vmatmul.mubr.msk.bf16.vlgmr.msra.gmra.mxu0 %vm809_vm2, %v670_v52 }
 0x2c4   : > { %1590 = vmatprep.mubr.msk.bf16.mxu0 %vm1815_vm1, %v1814_v9 }
 0x310   : > { %v850_v56 = vpop.f32.mrf.mxu1 }
 0x311   : > { %v902_v57 = vmul.f32 0.25, %v850_v56 }
 0x312   : > { %v1574_v58 = vpop.f32.mrf.mxu1 }
 0x313   : > { %v911_v59 = vsel %vm908_vm4, %v902_v57, -1e+30 }
 0x314   : > { %v853_v60 = vpop.f32.mrf.mxu1  ;;  %v914_v61 = vsel %vm913_vm5, %v911_v59, -inf }
 0x315   : > { %915 = vmax.xlane.f32.xlu0 %v914_v61  ;;  %v1493_v61 = vld [vmem:[%s2232_s10] ss:$0 sm:$0xff] }
 0x316   : > { %v1575_v62 = vpop.f32.mrf.mxu1 }
 0x32b   : > { %804 = vrot.lane.b32.xlu0 %v798_v41, %s1816_s24  ;;  %s1380_s24 = scalar_lea.sflag [#allocation4], %s2006_s22 }
 0x383   : > { %v896_v63 = vpop.f32.mrf.mxu0 }
 0x384   : > { %v903_v0 = vmul.f32 0.25, %v896_v63 }
 0x385   : > { %v1580_v2 = vpop.f32.mrf.mxu0 }
 0x386   : > { %v912_v3 = vsel %vm908_vm4, %v903_v0, -1e+30 }
 0x387   : > { %v899_v4 = vpop.f32.mrf.mxu0  ;;  %v917_v5 = vsel %vm913_vm5, %v912_v3, -inf }
 0x388   : > { %918 = vmax.xlane.f32.xlu1 %v917_v5 }
 0x389   : > { %v1581_v6 = vpop.f32.mrf.mxu0 }
 0x39e   : > { %v916_v7 = vpop.xlane.xlu0 %915 }
 0x39f   : > { %v920_v8 = vmax.f32 %v916_v7, -1e+30 }
 0x3a1   : > { %v928_v10 = vsub.f32 %v911_v59, %v920_v8  ;;  %v922_v27 = vsub.f32 -1e+30, %v920_v8 }
 0x3a2   : > { %v805_v11 = vpop.permute.xlu0 %804 }
 0x3a3   : > { %v930_v12 = vmul.f32 1.442695, %v928_v10  ;;  %v808_v13 = vpack.c.bf16 %v805_v11, %v805_v11  ;;  %v924_v28 = vmul.f32 1.442695, %v922_v27  ;;  %v1692_v11 = vld [vmem:[%s2235_s13] sm:$0xff]   ;;  %v1698_v27 = vld [vmem:[%s2237_s15 + $0x10] sm:$0xff]  }
 0x3a5   : > { %v997_v14 = vsel %vm949_vm3, %v808_v13, 0  ;;  %1703 = vpow2.f32 %v930_v12 }
 0x3a6   : > { %1589 = vmatpush3.bf16.msra.mxu0 %v997_v14 }
 0x3a7   : > { %1600 = vmatprep.subr.bf16.mxu0 %v1814_v9 }
 0x3b2   : > { %v1704_v15 = vpop.eup %1703 }
 0x3b3   : > { %v936_v16 = vsel %vm913_vm5, %v1704_v15, 0.0  ;;  %v944_v17 = vpack.c.bf16 %v1704_v15, %v1704_v15 }
 0x3b4   : > { %937 = vadd.xlane.f32.xlu0 %v936_v16  ;;  %v1494_v16 = vld [vmem:[%s2233_s11] ss:$0 sm:$0xff] }
 0x3b5   : > { %1585 = vmatmul.mubr.msk.bf16.vlgmr.msra.gmra.mxu1 %vm913_vm5, %v944_v17 }
 0x3b6   : > { %1596 = vmatprep.mubr.msk.bf16.mxu1 %vm1815_vm1, %v1814_v9  ;;  %1595 = vmatpush3.bf16.msra.mxu1 %v1690_v26  ;;  %v1697_v26 = vld [vmem:[%s2237_s15 + $0x18] sm:$0xff]  }
 0x3b7   : > { %1606 = vmatprep.subr.bf16.mxu1 %v1814_v9 }
 0x411   : > { %v919_v18 = vpop.xlane.xlu1 %918 }
 0x412   : > { %v921_v19 = vmax.f32 %v919_v18, -1e+30  ;;  %v1495_v18 = vld [vmem:[%s2234_s12] ss:$0 sm:$0xff] }
 0x414   : > { %v929_v20 = vsub.f32 %v912_v3, %v921_v19  ;;  %v923_v41 = vsub.f32 -1e+30, %v921_v19 }
 0x416   : > { %v932_v21 = vmul.f32 1.442695, %v929_v20  ;;  %v926_v42 = vmul.f32 1.442695, %v923_v41 }
 0x418   : > { %1705 = vpow2.f32 %v932_v21 }
 0x419   : > { %1707 = vpow2.f32 %v924_v28  ;;  %v1699_v28 = vld [vmem:[%s2237_s15 + $0x8] sm:$0xff]  }
 0x425   : > { %v1706_v22 = vpop.eup %1705 }
 0x426   : > { %v939_v24 = vsel %vm913_vm5, %v1706_v22, 0.0  ;;  %v945_v25 = vpack.c.bf16 %v1706_v22, %v1706_v22  ;;  %v1708_v29 = vpop.eup %1707  ;;  %v1693_v22 = vld [vmem:[%s2237_s15 + $0x38] sm:$0xff]  }
 0x427   : > { %940 = vadd.xlane.f32.xlu1 %v939_v24  ;;  %v934_v31 = vmul.f32 0.0, %v1708_v29  ;;  %v1695_v24 = vld [vmem:[%s2237_s15 + $0x28] sm:$0xff]   ;;  %v1700_v29 = vld [vmem:[%s2237_s15] sm:$0xff]  }
 0x428   : > { %1591 = vmatmul.mubr.msk.bf16.vlgmr.msra.gmra.mxu0 %vm913_vm5, %v945_v25  ;;  %v1696_v25 = vld [vmem:[%s2237_s15 + $0x20] sm:$0xff]  }
 0x429   : > { %1601 = vmatpush3.bf16.msra.mxu0 %v1689_v23  ;;  %1602 = vmatprep.mubr.msk.bf16.mxu0 %vm1815_vm1, %v1814_v9  ;;  %v1694_v23 = vld [vmem:[%s2237_s15 + $0x30] sm:$0xff]  }
 0x42a   : > { %1614 = vmatprep.subr.bf16.mxu0 %v1814_v9 }
 0x43d   : > { %v938_v30 = vpop.xlane.xlu0 %937 }
 0x43e   : > { %v942_v32 = vadd.f32 %v938_v30, %v934_v31  ;;  %v1496_v30 = vld [vmem:[%s2236_s14] ss:$0 sm:$0xff] }
 0x440   : > { %1709 = vrcp.f32 %v942_v32 }
 0x441   : > { %1711 = vpow2.f32 %v926_v42 }
 0x44d   : > { %v1710_v35 = vpop.eup %1709 }
 0x44e   : > { %v1712_v43 = vpop.eup %1711 }
 0x44f   : > { %v935_v45 = vmul.f32 0.0, %v1712_v43 }
 0x475   : > { %v987_v33 = vpop.f32.mrf.mxu1 }
 0x476   : > { %v1039_v34 = vadd.f32 %v987_v33, %v934_v31 }
 0x477   : > { %v1586_v36 = vpop.f32.mrf.mxu1 }
 0x478   : > { %v1043_v37 = vmul.f32 %v1710_v35, %v1039_v34 }
 0x479   : > { %v990_v38 = vpop.f32.mrf.mxu1 }
 0x47a   : > { %v1045_v39 = vpack.c.bf16 %v1043_v37, %v1043_v37 }
 0x47b   : > { %v1587_v40 = vpop.f32.mrf.mxu1 }
 0x47c   : > { %1603 = vmatmul.mubr.msk.bf16.vlgmr.msra.gmra.mxu0 %vm809_vm2, %v1045_v39 }
 0x47d   : > { %1630 = vmatprep.mubr.msk.bf16.mxu0 %vm1815_vm1, %v1814_v9  ;;  %1615 = vmatpush3.bf16.msra.mxu0 %v1693_v22 }
 0x47e   : > { %1616 = vmatprep.subr.bf16.mxu0 %v1814_v9 }
 0x481   : > { %1617 = vmatpush3.bf16.msra.mxu0 %v1694_v23 }
 0x482   : > { %1618 = vmatprep.subr.bf16.mxu0 %v1814_v9 }
 0x485   : > { %1619 = vmatpush3.bf16.msra.mxu0 %v1695_v24 }
 0x486   : > { %1620 = vmatprep.subr.bf16.mxu0 %v1814_v9 }
 0x489   : > { %1621 = vmatpush3.bf16.msra.mxu0 %v1696_v25 }
 0x48a   : > { %1622 = vmatprep.subr.bf16.mxu0 %v1814_v9 }
 0x48d   : > { %1623 = vmatpush3.bf16.msra.mxu0 %v1697_v26 }
 0x48e   : > { %1624 = vmatprep.subr.bf16.mxu0 %v1814_v9 }
 0x491   : > { %1625 = vmatpush3.bf16.msra.mxu0 %v1698_v27 }
 0x492   : > { %1626 = vmatprep.subr.bf16.mxu0 %v1814_v9 }
 0x495   : > { %1627 = vmatpush3.bf16.msra.mxu0 %v1699_v28 }
 0x496   : > { %1628 = vmatprep.subr.bf16.mxu0 %v1814_v9 }
 0x499   : > { %1629 = vmatpush3.bf16.msra.mxu0 %v1700_v29 }
 0x4b0   : > { %v941_v44 = vpop.xlane.xlu1 %940 }
 0x4b1   : > { %v943_v46 = vadd.f32 %v941_v44, %v935_v45 }
 0x4b3   : > { %1713 = vrcp.f32 %v943_v46 }
 0x4c0   : > { %v1714_v49 = vpop.eup %1713 }
 0x4e8   : > { %v1033_v47 = vpop.f32.mrf.mxu0 }
 0x4e9   : > { %v1040_v48 = vadd.f32 %v1033_v47, %v935_v45  ;;  %v1500_v45 = vld [vmem:[%s2275_s21] ss:$0 sm:$0xff]  ;;  %s1753_s21 = scalar_lea.vmem %s1752_s29, 128 }
 0x4ea   : > { %v1592_v50 = vpop.f32.mrf.mxu0  ;;  %p1755_p5 = scmp.lt.s32.totalorder %s1753_s21, %s1747_s19 }
 0x4eb   : > { %v1044_v51 = vmul.f32 %v1714_v49, %v1040_v48 }
 0x4ec   : > { %v1036_v52 = vpop.f32.mrf.mxu0  ;;  %p1756_p8 = por %p1755_p5, %p1754_p3 }
 0x4ed   : > { %v1048_v53 = vpack.c.bf16 %v1044_v51, %v1044_v51 }
 0x4ee   : > { %v1593_v54 = vpop.f32.mrf.mxu0  ;;  %p1757_p10 = pnand %p1756_p8, %p1750_p1 }
 0x4ef   : > { %1597 = vmatmul.mubr.msk.bf16.vlgmr.msra.gmra.mxu1 %vm809_vm2, %v1048_v53 }
 0x4f0   : > { %1610 = vmatprep.mubr.msk.bf16.mxu1 %vm1815_vm1, %v1814_v9 }
 0x53c   : > { %v1143_v55 = vpop.f32.mrf.mxu0 }
 0x53e   : > { %v1604_v56 = vpop.f32.mrf.mxu0 }
 0x540   : > { %v1146_v57 = vpop.f32.mrf.mxu0 }
 0x542   : > { %v1605_v58 = vpop.f32.mrf.mxu0 }
 0x5af   : > { %v1094_v59 = vpop.f32.mrf.mxu1 }
 0x5b0   : > { %v1144_v60 = vadd.f32 %v1143_v55, %v1094_v59 }
 0x5b1   : > { %v1598_v62 = vpop.f32.mrf.mxu1 }
 0x5b2   : > { %v1149_v63 = vadd.f32 %v1144_v60, %v2016_v1  ;;  %v1691_v1 = vld [vmem:[%s2235_s13 + $0x8] sm:$0xff]  }
 0x5b3   : > { %v1097_v0 = vpop.f32.mrf.mxu1  ;;  %1607 = vmatpush3.bf16.msra.mxu1 %v1691_v1 }
 0x5b4   : > { %v2121_v2 = vadd.f32 %v1493_v61, %v1149_v63  ;;  %1608 = vmatprep.subr.bf16.mxu1 %v1814_v9 }
 0x5b5   : > { %v1599_v3 = vpop.f32.mrf.mxu1 }
 0x5b6   : > { %v1160_v4 = vsel %vm569_vm0, %v2121_v2, 0.0 }
 0x5b7   : > { %1161 = vadd.xlane.f32.xlu1 %v1160_v4  ;;  %1609 = vmatpush3.bf16.msra.mxu1 %v1692_v11 }
 0x640   : > { %v1162_v5 = vpop.xlane.xlu1 %1161 }
 0x641   : > { %v1163_v6 = vmul.f32 0.03125, %v1162_v5 }
 0x643   : > { %v1164_v7 = vsub.f32 %v2121_v2, %v1163_v6 }
 0x645   : > { %v1165_v8 = vmul.f32 %v1164_v7, %v1164_v7 }
 0x647   : > { %v1166_v10 = vsel %vm569_vm0, %v1165_v8, 0.0 }
 0x648   : > { %1167 = vadd.xlane.f32.xlu1 %v1166_v10 }
 0x6d1   : > { %v1168_v12 = vpop.xlane.xlu1 %1167 }
 0x6d2   : > { %v1169_v13 = vmul.f32 0.03125, %v1168_v12 }
 0x6d4   : > { %v1170_v14 = vadd.f32 1e-05, %v1169_v13 }
 0x6d6   : > { %1715 = vrsqrt.f32 %v1170_v14 }
 0x6e3   : > { %v1716_v15 = vpop.eup %1715 }
 0x6e4   : > { %v1172_v17 = vmul.f32 %v1716_v15, %v1164_v7 }
 0x6e6   : > { %v1179_v19 = vmul.f32 %v1494_v16, %v1172_v17 }
 0x6e8   : > { %v1186_v20 = vadd.f32 %v1495_v18, %v1179_v19 }
 0x6ea   : > { %v1187_v21 = vpack.c.bf16 %v1186_v20, %v1186_v20 }
 0x6ec   : > { %1611 = vmatmul.mubr.msk.bf16.vlgmr.msra.gmra.mxu1 %vm569_vm0, %v1187_v21 }
 0x7ac   : > { %v1248_v31 = vpop.f32.mrf.mxu1 }
 0x7ad   : > { %v1249_v32 = vadd.f32 %v1496_v30, %v1248_v31 }
 0x7ae   : > { %v1612_v33 = vpop.f32.mrf.mxu1 }
 0x7af   : > { %v1255_v34 = vmul.f32 0.044715, %v1249_v32  ;;  %v1254_v9 = vmul.f32 0.5, %v1249_v32 }
 0x7b0   : > { %v1251_v35 = vpop.f32.mrf.mxu1 }
 0x7b1   : > { %v1256_v36 = vmul.f32 %v1255_v34, %v1249_v32 }
 0x7b2   : > { %v1613_v37 = vpop.f32.mrf.mxu1 }
 0x7b3   : > { %v1257_v38 = vmul.f32 %v1256_v36, %v1249_v32 }
 0x7b5   : > { %v1258_v39 = vadd.f32 %v1257_v38, %v1249_v32 }
 0x7b7   : > { %v1259_v40 = vmul.f32 0.7978846, %v1258_v39 }
 0x7b9   : > { %1717 = vtanh.f32 %v1259_v40 }
 0x7c6   : > { %v1718_v41 = vpop.eup %1717 }
 0x7c7   : > { %v1261_v42 = vadd.f32 1.0, %v1718_v41 }
 0x7c9   : > { %v1262_v43 = vmul.f32 %v1261_v42, %v1254_v9 }
 0x7cb   : > { %v1263_v44 = vpack.c.bf16 %v1262_v43, %v1262_v43 }
 0x7cd   : > { %1631 = vmatmul.mubr.bf16.vlgmr.msra.gmra.mxu0 %v1263_v44 }
 0x88d   : > { %v1369_v46 = vpop.f32.mrf.mxu0 }
 0x88e   : > { %v1370_v47 = vadd.f32 %v1500_v45, %v1369_v46 }
 0x88f   : > { %v1632_v48 = vpop.f32.mrf.mxu0 }
 0x890   : > { %v1375_v49 = vadd.f32 %v1370_v47, %v2121_v2 }
 0x891   : > { %v1372_v50 = vpop.f32.mrf.mxu0 }
 0x892   : > { %v1376_v51 = vpack.c.bf16 %v1375_v49, %v1375_v49 }
 0x893   : > { %v1633_v52 = vpop.f32.mrf.mxu0 }
 0x894   : > { %1378 = vst.msk [vmem:[%s563_s28] sm:$0xf] %vm1377_vm6, %v1376_v51 }
 0x895   : > { %1760 = shalt.err (!%p1757_p10)
}
 0x896   : > { %s1761_s26 = scalar_lea.hbm %s2185_s18, 64  ;;  %s1765_s1 = scalar_lea.hbm %s2277_s23, 128 }
 0x897   : > { %p1762_p2 = scmp.ne.s32.totalorder %s2185_s18, %s1761_s26  ;;  %p1766_p7 = scmp.lt.s32.totalorder %s2185_s18, %s2277_s23 }
 0x898   : > { %p1767_p0 = scmp.lt.s32.totalorder %s1765_s1, %s1761_s26 }
 0x899   : > { %p1763_p4 = pnand %p1762_p2, %p2278_p12 }
 0x89a   : > { %p1768_p6 = por %p1767_p0, %p1766_p7 }
 0x89b   : > { %p1764_p9 = pneg %p1763_p4 }
 0x89d   : > { %p1769_p11 = pnand %p1768_p6, %p1764_p9 }
 0x89f   : > { %1772 = shalt.err (!%p1769_p11)
}
 0x8a0   : > { %1636 = dma.vmem_to_hbm [thread:$0]  (%p2278_p12), %s1394_s20, 64, %s2185_s18, %s1380_s24  }
 0x8a1 PF: > { %s2279_s19 = sld [smem:[#allocation8_spill]]  ;;  %p2282_p1 = scmp.ge.s32.totalorder %s1811_s27, 2 }
 0x8a2   : > { %s2280_s29 = sld [smem:[#allocation14_spill]] }
 0x8a7   : > { %s1405_s21 = sand.u32 1, %s2279_s19  }
 0x8a8   : > { %p2281_p13 = scmp.ne.s32.totalorder %s2280_s29, 0  ;;  %s1406_s22 = scalar_lea.sflag [#allocation4], %s1405_s21 }
 0x8aa   : > { %p1643_p3 = pnand %p2282_p1, %p2281_p13 }
 0x8ac   : > { %p1644_p5 = pneg %p1643_p3 }
 0x8ae   : > { %1794 = dma.done.wait (%p1644_p5), %s1406_s22, 64  }
 0x8af   : > { %1796 = vsyncadd (%p1644_p5), %s1406_s22, 4294967232  ;;  %s2283_s27 = sld [smem:[#allocation11_spill]]  ;;  %s2286_s24 = smov %s1803_s25 }
 0x8b0   : > { %s2284_s26 = sld [smem:[#allocation9_spill]] }
 0x8b1   : > { %s2285_s28 = sld [smem:[#allocation12_spill]] }
 0x8b5   : > { %p30_p8 = scmp.ge.s32.totalorder %s2283_s27, 4  }
 0x8b6   : > { %s2287_s25 = smov %s2284_s26 }
 0x8b7   : > { %s2288_s26 = smov %s2285_s28  ;;  %32 = sbr.rel (!%p30_p8) target bundleno = 10 (0xa), region = 133 }
 0x8bc   :  { %1411 = vsyncpa [#allocation3], 1 }
 0x8bd   :  { %1413 = vsyncpa [#allocation3 + $0x1], 1 }
 0x8be   :  { %1414 = vsyncpa [#allocation4], 1 }
 0x8bf   :  { %1416 = vsyncpa [#allocation4 + $0x1], 1 }

</bundles_post_ra>
